<compile_context>
chip_gen: v7x
topology: tpu7x:2x2x1
jax: 0.10.0
libtpu: 0.0.40
codegen_flags: <defaults>
</compile_context>

<pallas_src>
import functools

import jax
import jax.numpy as jnp
from jax.experimental import pallas as pl
from jax.experimental.pallas import tpu as pltpu

EPS = 1e-5
FOLD = 8  # row-fold factor for the lane-dense BN apply pass


def _round_up(x, m):
    return ((x + m - 1) // m) * m


def _vmem_limit_bytes():
    """Generation-aware scoped-VMEM limit: ~3/4 of physical, capped at 100 MiB."""
    cap = 64 * 1024 * 1024
    try:
        cap = int(pltpu.get_tpu_info().vmem_capacity_bytes)
    except Exception:
        pass
    return min((cap * 3) // 4, 100 * 1024 * 1024)


def _gcn_agg_kernel(a_ref, xw_ref, h_ref, stats_ref, *, tile_k):
    """Tiled GCN aggregation: h_rowtile = sum_k A[i,k] @ XW[k], plus BN moments.

    grid = (row_tiles, k_tiles); k (last grid axis) is the reduction.
      a_ref:     (TILE_N, TILE_K)   normalized adjacency tile (mm_dtype, streamed)
      xw_ref:    (N_cols, Fout)     x @ W^T, mm_dtype, fully VMEM-resident
      h_ref:     (TILE_N, Fout)     f32 output block, resident across k (accumulator)
      stats_ref: (8, Fout)          BN moments; row 0 = sum(h), row 1 = sum(h*h)
    """
    k = pl.program_id(1)
    nk = pl.num_programs(1)

    @pl.when(k == 0)
    def _():
        h_ref[...] = jnp.zeros_like(h_ref)

    start = pl.multiple_of(k * tile_k, tile_k)
    xw = xw_ref[pl.ds(start, tile_k), :]
    h_ref[...] += jnp.dot(a_ref[...], xw, preferred_element_type=jnp.float32)

    @pl.when(k == nk - 1)
    def _():
        h = h_ref[...]
        stats_ref[0:1, :] = jnp.sum(h, axis=0, keepdims=True)
        stats_ref[1:2, :] = jnp.sum(h * h, axis=0, keepdims=True)


def _bn_apply_kernel(h_ref, scale_ref, shift_ref, o_ref):
    """Lane-dense BatchNorm apply: out = h * scale + shift (2 VALU ops / element)."""
    o_ref[...] = h_ref[...] * scale_ref[...] + shift_ref[...]


def conv_norm_block(x, edge_index, edge_weight, w, b, gamma, beta,
                    *, mm_dtype=jnp.bfloat16):
    """ConvNormBlock forward (GCNConv + BatchNorm).

    `b` (the GCNConv bias) is accepted for API parity but not used: BatchNorm's mean
    subtraction cancels a per-column bias exactly, so skipping the add saves a full
    (N, Fout) VPU pass and one DMA with no change in result.
    """
    del b  # cancelled exactly by the BatchNorm mean subtraction
    N, Fin = x.shape
    Fout = w.shape[0]

    itemsize = jnp.dtype(mm_dtype).itemsize
    sub = {4: 8, 2: 16, 1: 32}[itemsize]        # sublane multiple for mm_dtype tiles

    # ---- tiling: pad N up to the tile grid instead of shrinking tiles ----
    if N <= 512:
        tile_n = _round_up(N, sub)              # single row tile (also FOLD-aligned)
    else:
        tile_n = 512                            # >= 2 row tiles -> megacore on v7x
    n_rows = _round_up(N, tile_n)
    row_tiles = n_rows // tile_n

    target_k = 2048 if itemsize <= 2 else 1024
    if N <= target_k:
        tile_k = _round_up(N, 128)
    else:
        tile_k = target_k
    n_cols = _round_up(N, tile_k)
    k_tiles = n_cols // tile_k

    vmem_limit = _vmem_limit_bytes()

    # ---- glue: gcn_norm (self loops, symmetric normalization), densify (padded) ----
    x_f32 = x.astype(jnp.float32)
    w_f32 = w.astype(jnp.float32)
    loop_idx = jnp.arange(N, dtype=edge_index.dtype)
    row = jnp.concatenate([edge_index[0], loop_idx])          # source nodes
    col = jnp.concatenate([edge_index[1], loop_idx])          # target nodes
    ew = jnp.concatenate([edge_weight.astype(jnp.float32),
                          jnp.ones((N,), jnp.float32)])
    deg = jnp.zeros((N,), jnp.float32).at[col].add(ew)
    dinv = jnp.where(deg > 0, jax.lax.rsqrt(deg), 0.0)
    norm = dinv[row] * ew * dinv[col]
    # Scatter directly into the padded mm_dtype adjacency (no f32 densify + recast
    # pass over the O(N^2) array); padded rows/cols stay exactly zero.
    a = jnp.zeros((n_rows, n_cols), mm_dtype).at[col, row].add(norm.astype(mm_dtype))

    # XW = x @ W^T computed once (tiny), zero-padded to the K grid, cast to mm_dtype.
    xw = x_f32 @ w_f32.T                                        # (N, Fout) f32
    xw = jnp.pad(xw, ((0, n_cols - N), (0, 0))).astype(mm_dtype)

    # ---- pass 1: streamed-A aggregation + per-row-tile BN moments ----
    h, stats = pl.pallas_call(
        functools.partial(_gcn_agg_kernel, tile_k=tile_k),
        grid=(row_tiles, k_tiles),
        in_specs=[
            pl.BlockSpec((tile_n, tile_k), lambda i, k: (i, k)),    # A (streamed)
            pl.BlockSpec((n_cols, Fout), lambda i, k: (0, 0)),      # XW (resident)
        ],
        out_specs=[
            pl.BlockSpec((tile_n, Fout), lambda i, k: (i, 0)),      # h (acc over k)
            pl.BlockSpec((None, 8, Fout), lambda i, k: (i, 0, 0)),  # BN moments
        ],
        out_shape=[
            jax.ShapeDtypeStruct((n_rows, Fout), jnp.float32),
            jax.ShapeDtypeStruct((row_tiles, 8, Fout), jnp.float32),
        ],
        compiler_params=pltpu.CompilerParams(
            dimension_semantics=("parallel", "arbitrary"),
            vmem_limit_bytes=vmem_limit),
    )(a, xw)

    # ---- hoisted BN statistics (tiny, once): mean/var -> scale/shift ----
    inv_n = 1.0 / N                                   # true N, not padded N
    s1 = jnp.sum(stats[:, 0, :], axis=0, keepdims=True)   # (1, Fout)
    s2 = jnp.sum(stats[:, 1, :], axis=0, keepdims=True)
    mean = s1 * inv_n
    var = jnp.maximum(s2 * inv_n - mean * mean, 0.0)  # clamp: guards f32 cancellation
    scale = gamma.reshape(1, Fout).astype(jnp.float32) * jax.lax.rsqrt(var + EPS)
    shift = beta.reshape(1, Fout).astype(jnp.float32) - mean * scale

    # ---- pass 2: lane-dense BN apply (last dim = FOLD*Fout, full vst stores) ----
    lanes = FOLD * Fout
    rows2 = n_rows // FOLD
    tile_r = tile_n // FOLD
    h2 = h.reshape(rows2, lanes)                       # contiguous reshape (free)
    scale_w = jnp.tile(scale, (1, FOLD))               # (1, FOLD*Fout)
    shift_w = jnp.tile(shift, (1, FOLD))

    out2 = pl.pallas_call(
        _bn_apply_kernel,
        grid=(row_tiles,),
        in_specs=[
            pl.BlockSpec((tile_r, lanes), lambda i: (i, 0)),
            pl.BlockSpec((1, lanes), lambda i: (0, 0)),
            pl.BlockSpec((1, lanes), lambda i: (0, 0)),
        ],
        out_specs=pl.BlockSpec((tile_r, lanes), lambda i: (i, 0)),
        out_shape=jax.ShapeDtypeStruct((rows2, lanes), jnp.float32),
        compiler_params=pltpu.CompilerParams(
            dimension_semantics=("parallel",),
            vmem_limit_bytes=vmem_limit),
    )(h2, scale_w, shift_w)

    return out2.reshape(n_rows, Fout)[:N]


def conv_norm_block_ref(x, edge_index, edge_weight, w, b, gamma, beta):
    """Pure-JAX reference (includes the conv bias; BN cancels it exactly)."""
    N, _ = x.shape
    loop_idx = jnp.arange(N, dtype=edge_index.dtype)
    row = jnp.concatenate([edge_index[0], loop_idx])
    col = jnp.concatenate([edge_index[1], loop_idx])
    ew = jnp.concatenate([edge_weight, jnp.ones((N,), edge_weight.dtype)])
    deg = jnp.zeros((N,), jnp.float32).at[col].add(ew)
    dinv = jnp.where(deg > 0, jax.lax.rsqrt(deg), 0.0)
    norm = dinv[row] * ew * dinv[col]
    a = jnp.zeros((N, N), jnp.float32).at[col, row].add(norm)
    h = a @ (x @ w.T) + b
    mean = jnp.mean(h, axis=0, keepdims=True)
    var = jnp.mean((h - mean) ** 2, axis=0, keepdims=True)
    return gamma * (h - mean) / jnp.sqrt(var + EPS) + beta


if __name__ == "__main__":
    # Small synthetic graph consistent with ConvNormBlock(input_dim=8, mult_features=2)
    N = 16          # number of nodes
    E = 40          # number of edges
    input_dim = 8
    mult_features = 2
    output_dim = mult_features * input_dim  # 16

    key = jax.random.PRNGKey(0)
    k_x, k_e, k_w, k_wt, k_g, k_bta = jax.random.split(key, 6)

    x = jax.random.normal(k_x, (N, input_dim), dtype=jnp.float32)
    edge_index = jax.random.randint(k_e, (2, E), 0, N, dtype=jnp.int32)
    edge_weight = jax.random.uniform(k_wt, (E,), dtype=jnp.float32) + 0.1

    # Parameters (shapes per module __init__; deterministic synthetic init).
    w = 0.2 * jax.random.normal(k_w, (output_dim, input_dim), dtype=jnp.float32)
    b = 0.1 * jnp.arange(output_dim, dtype=jnp.float32)
    gamma = 1.0 + 0.05 * jax.random.normal(k_g, (output_dim,), dtype=jnp.float32)
    beta = 0.05 * jax.random.normal(k_bta, (output_dim,), dtype=jnp.float32)

    ref = conv_norm_block_ref(x, edge_index, edge_weight, w, b, gamma, beta)

    # f32 MXU path: tight correctness check.
    out_f32 = conv_norm_block(x, edge_index, edge_weight, w, b, gamma, beta,
                              mm_dtype=jnp.float32)
    out_f32 = jax.block_until_ready(out_f32)
    assert out_f32.shape == (N, output_dim)
    assert jnp.allclose(out_f32, ref, rtol=1e-4, atol=1e-4), "f32 mismatch vs reference"

    # Default bf16 MXU path (halves the dominant O(N^2) adjacency traffic): loose check.
    out_bf16 = conv_norm_block(x, edge_index, edge_weight, w, b, gamma, beta)
    out_bf16 = jax.block_until_ready(out_bf16)
    assert out_bf16.shape == (N, output_dim)
    assert jnp.allclose(out_bf16, ref, rtol=1e-1, atol=1e-1), "bf16 path diverged"

    print("KERNEL_OK")
</pallas_src>

<mosaic_0001>
module attributes {stable_mosaic.version = 11 : i64} {
  func.func @_gcn_agg_kernel(%arg0: i32, %arg1: i32, %arg2: memref<16x128xf32, #tpu.memory_space<vmem>>, %arg3: memref<128x16xf32, #tpu.memory_space<vmem>>, %arg4: memref<16x16xf32, #tpu.memory_space<vmem>>, %arg5: memref<1x8x16xf32, #tpu.memory_space<vmem>>) attributes {dimension_semantics = [#tpu.dimension_semantics<parallel>, #tpu.dimension_semantics<arbitrary>], iteration_bounds = array<i64: 1, 1>, scalar_prefetch = 0 : i64, scratch_operands = 0 : i64, tpu.core_type = #tpu.core_type<tc>, window_params = [{transform_indices = @transform_0, window_bounds = array<i64: 16, 128>}, {pipeline_mode = #tpu.pipeline_mode<synchronous>, transform_indices = @transform_1, window_bounds = array<i64: 128, 16>}, {transform_indices = @transform_2, window_bounds = array<i64: 16, 16>}, {transform_indices = @transform_3, window_bounds = array<i64: 1, 8, 16>}]} {
    %c0_i32 = arith.constant 0 : i32
    %0 = arith.cmpi eq, %arg1, %c0_i32 : i32
    %1 = arith.extui %0 : i1 to i32
    %c0_i32_0 = arith.constant 0 : i32
    %2 = arith.cmpi ne, %1, %c0_i32_0 : i32
    scf.if %2 {
      %cst_9 = arith.constant 0.000000e+00 : f32
      %15 = vector.broadcast %cst_9 : f32 to vector<16x16xf32>
      %c0_10 = arith.constant 0 : index
      %c0_11 = arith.constant 0 : index
      %16 = vector.load %arg4[%c0_10, %c0_11] : memref<16x16xf32, #tpu.memory_space<vmem>>, vector<16x16xf32>
      tpu.vector_store %arg4[%c0_10, %c0_11], %15 {strides = array<i32>} : memref<16x16xf32, #tpu.memory_space<vmem>>, vector<16x16xf32>,
    } else {
    }
    %c128_i32 = arith.constant 128 : i32
    %3 = arith.muli %arg1, %c128_i32 : i32
    %4 = tpu.assume_multiple %3, 128 : i32
    %5 = arith.index_cast %4 : i32 to index
    %c0 = arith.constant 0 : index
    %6 = vector.load %arg3[%5, %c0] : memref<128x16xf32, #tpu.memory_space<vmem>>, vector<128x16xf32>
    %c0_1 = arith.constant 0 : index
    %c0_2 = arith.constant 0 : index
    %7 = vector.load %arg4[%c0_1, %c0_2] : memref<16x16xf32, #tpu.memory_space<vmem>>, vector<16x16xf32>
    %c0_3 = arith.constant 0 : index
    %c0_4 = arith.constant 0 : index
    %8 = vector.load %arg2[%c0_3, %c0_4] : memref<16x128xf32, #tpu.memory_space<vmem>>, vector<16x128xf32>
    %cst = arith.constant dense<0.000000e+00> : vector<16x16xf32>
    %9 = tpu.matmul %8, %6, %cst {dimension_numbers = #tpu.dot_dimension_numbers<[1], [0], [0], [1], [0, 0, 1, 1], [], []>} : vector<16x128xf32>, vector<128x16xf32>, vector<16x16xf32> -> vector<16x16xf32>
    %10 = arith.addf %7, %9 : vector<16x16xf32>
    %c0_5 = arith.constant 0 : index
    %c0_6 = arith.constant 0 : index
    %11 = vector.load %arg4[%c0_5, %c0_6] : memref<16x16xf32, #tpu.memory_space<vmem>>, vector<16x16xf32>
    tpu.vector_store %arg4[%c0_5, %c0_6], %10 {strides = array<i32>} : memref<16x16xf32, #tpu.memory_space<vmem>>, vector<16x16xf32>,
    %c0_i32_7 = arith.constant 0 : i32
    %12 = arith.cmpi eq, %arg1, %c0_i32_7 : i32
    %13 = arith.extui %12 : i1 to i32
    %c0_i32_8 = arith.constant 0 : i32
    %14 = arith.cmpi ne, %13, %c0_i32_8 : i32
    scf.if %14 {
      %c0_9 = arith.constant 0 : index
      %c0_10 = arith.constant 0 : index
      %15 = vector.load %arg4[%c0_9, %c0_10] : memref<16x16xf32, #tpu.memory_space<vmem>>, vector<16x16xf32>
      %cst_11 = arith.constant dense<0.000000e+00> : vector<16xf32>
      %16 = vector.multi_reduction <add>, %15, %cst_11 [0] : vector<16x16xf32> to vector<16xf32>
      %17 = vector.shape_cast %16 : vector<16xf32> to vector<1x16xf32>
      %c0_12 = arith.constant 0 : index
      %c0_13 = arith.constant 0 : index
      %c0_14 = arith.constant 0 : index
      %18 = vector.load %arg5[%c0_12, %c0_13, %c0_14] : memref<1x8x16xf32, #tpu.memory_space<vmem>>, vector<1x1x16xf32>
      %19 = vector.shape_cast %18 : vector<1x1x16xf32> to vector<1x16xf32>
      %20 = vector.shape_cast %17 : vector<1x16xf32> to vector<1x1x16xf32>
      tpu.vector_store %arg5[%c0_12, %c0_13, %c0_14], %20 {strides = array<i32>} : memref<1x8x16xf32, #tpu.memory_space<vmem>>, vector<1x1x16xf32>,
      %21 = arith.mulf %15, %15 : vector<16x16xf32>
      %cst_15 = arith.constant dense<0.000000e+00> : vector<16xf32>
      %22 = vector.multi_reduction <add>, %21, %cst_15 [0] : vector<16x16xf32> to vector<16xf32>
      %23 = vector.shape_cast %22 : vector<16xf32> to vector<1x16xf32>
      %c0_16 = arith.constant 0 : index
      %c1 = arith.constant 1 : index
      %c0_17 = arith.constant 0 : index
      %24 = vector.load %arg5[%c0_16, %c1, %c0_17] : memref<1x8x16xf32, #tpu.memory_space<vmem>>, vector<1x1x16xf32>
      %25 = vector.shape_cast %24 : vector<1x1x16xf32> to vector<1x16xf32>
      %26 = vector.shape_cast %23 : vector<1x16xf32> to vector<1x1x16xf32>
      tpu.vector_store %arg5[%c0_16, %c1, %c0_17], %26 {strides = array<i32>} : memref<1x8x16xf32, #tpu.memory_space<vmem>>, vector<1x1x16xf32>,
    } else {
    }
    return
  }
  func.func @transform_0(%arg0: i32, %arg1: i32) -> (i32, i32) {
    %c0_i32 = arith.constant 0 : i32
    return %arg0, %arg1 : i32, i32
  }
  func.func @transform_1(%arg0: i32, %arg1: i32) -> (i32, i32) {
    %c0_i32 = arith.constant 0 : i32
    %c0_i32_0 = arith.constant 0 : i32
    %c0_i32_1 = arith.constant 0 : i32
    return %c0_i32, %c0_i32_0 : i32, i32
  }
  func.func @transform_2(%arg0: i32, %arg1: i32) -> (i32, i32) {
    %c0_i32 = arith.constant 0 : i32
    %c0_i32_0 = arith.constant 0 : i32
    return %arg0, %c0_i32 : i32, i32
  }
  func.func @transform_3(%arg0: i32, %arg1: i32) -> (i32, i32, i32) {
    %c0_i32 = arith.constant 0 : i32
    %c0_i32_0 = arith.constant 0 : i32
    %c0_i32_1 = arith.constant 0 : i32
    return %arg0, %c0_i32, %c0_i32_0 : i32, i32, i32
  }
}

</mosaic_0001>

<bundles_post_ra>
// kernel: tpu_custom_call.1
= control target key start
LH: loop header
LB: loop body
LE: loop exit
PB: predicated region body
PF: predicated region fallthrough
CT: control target
= control target key end

     0   :  { %9 = vsyncpa [#allocation3], 0  ;;  %vm19_vm0 = vcmask 130048   ;;  %v320_v5 = vmov 0.0   ;;  %s431_s0 = inlined_call_operand.vmem [shape: f32[16,128], index: 0, kind: input, shape index: {}]   ;;  %s432_s1 = inlined_call_operand.vmem [shape: f32[128,16], index: 1, kind: input, shape index: {}]   ;;  %s433_s2 = inlined_call_operand.hbm [shape: f32[16,16], index: 2, kind: output, shape index: {0}]   ;;  %s434_s3 = inlined_call_operand.hbm [shape: f32[1,8,16], index: 3, kind: output, shape index: {1}]  }
   0x1   :  { %v24_v0 = vld [vmem:[%s432_s1] sm:$0xff]  ;;  %v25_v1 = vld [vmem:[%s432_s1 + $0x8] sm:$0xff]  ;;  %v26_v2 = vld [vmem:[%s432_s1 + $0x10] sm:$0xff]  ;;  %21 = vst.msk [vmem:[#allocation2 + $0x8] sm:$0xff] %vm19_vm0, %v320_v5 }
   0x2   :  { %v235_v3 = vpack.c.bf16 %v25_v1, %v24_v0  ;;  %v27_v4 = vld [vmem:[%s432_s1 + $0x18] sm:$0xff]  ;;  %20 = vst.msk [vmem:[#allocation2] sm:$0xff] %vm19_vm0, %v320_v5  ;;  %v28_v7 = vld [vmem:[%s432_s1 + $0x20] sm:$0xff]  ;;  %v29_v8 = vld [vmem:[%s432_s1 + $0x28] sm:$0xff] }
   0x3   :  { %v239_v6 = vpack.c.bf16 %v27_v4, %v26_v2  ;;  %v243_v9 = vpack.c.bf16 %v29_v8, %v28_v7  ;;  %v42_v10 = vld [vmem:[%s431_s0] sm:$0xff]  ;;  %v30_v11 = vld [vmem:[%s432_s1 + $0x30] sm:$0xff]  ;;  %v31_v12 = vld [vmem:[%s432_s1 + $0x38] sm:$0xff] }
   0x4   :  { %236 = vmatprep.subr.bf16.mxu0 %v235_v3  ;;  %232 = vmatprep.mubr.f32.mxu0 %v42_v10 }
   0x5   :  { %238 = vmatpush3.bf16.msra.mxu0 %v235_v3 }
   0x6   :  { %240 = vmatprep.subr.bf16.mxu0 %v239_v6 }
   0x7   :  { %10 = vsyncpa [#allocation5], 0  ;;  %v247_v13 = vpack.c.bf16 %v31_v12, %v30_v11  ;;  %v32_v14 = vld [vmem:[%s432_s1 + $0x40] sm:$0xff]  ;;  %v33_v15 = vld [vmem:[%s432_s1 + $0x48] sm:$0xff]  ;;  %s321_s21 = smov [#allocation2]  }
   0x8   :  { %v251_v16 = vpack.c.bf16 %v33_v15, %v32_v14  ;;  %v34_v17 = vld [vmem:[%s432_s1 + $0x50] sm:$0xff]  ;;  %v35_v18 = vld [vmem:[%s432_s1 + $0x58] sm:$0xff]  ;;  %v36_v20 = vld [vmem:[%s432_s1 + $0x60] sm:$0xff]  ;;  %s157_s22 = sshll.u32 %s321_s21, 4  ;;  %s158_s22 = int_to_ptr.vmem [resolvable:$true] %s157_s22 }
   0x9   :  { %242 = vmatpush3.bf16.msra.mxu0 %v239_v6  ;;  %v255_v19 = vpack.c.bf16 %v35_v18, %v34_v17  ;;  %v37_v21 = vld [vmem:[%s432_s1 + $0x68] sm:$0xff]  ;;  %v38_v23 = vld [vmem:[%s432_s1 + $0x70] sm:$0xff]  ;;  %v39_v24 = vld [vmem:[%s432_s1 + $0x78] sm:$0xff]  ;;  %s272_s1 = scalar_lea.vmem %s158_s22, 256  ;;  %p277_p1 = scmp.lt.s32.totalorder %s158_s22, %s158_s22 }
   0xa   :  { %244 = vmatprep.subr.bf16.mxu0 %v243_v9  ;;  %v259_v22 = vpack.c.bf16 %v37_v21, %v36_v20  ;;  %v263_v25 = vpack.c.bf16 %v39_v24, %v38_v23  ;;  %v43_v26 = vld [vmem:[%s431_s0 + $0x8] sm:$0xff]  ;;  %v40_v28 = vld [vmem:[#allocation2] sm:$0xff]  ;;  %p273_p0 = scmp.ne.s32.totalorder %s158_s22, %s272_s1  ;;  %p278_p2 = scmp.lt.s32.totalorder %s272_s1, %s272_s1 }
   0xb   :  { %v41_v27 = vld [vmem:[#allocation2 + $0x8] sm:$0xff] }
   0xc   :  { %p279_p3 = por %p278_p2, %p277_p1 }
   0xd   :  { %246 = vmatpush3.bf16.msra.mxu0 %v243_v9 }
   0xe   :  { %248 = vmatprep.subr.bf16.mxu0 %v247_v13  ;;  %p280_p4 = pnand %p279_p3, %p273_p0 }
  0x11   :  { %250 = vmatpush3.bf16.msra.mxu0 %v247_v13 }
  0x12   :  { %252 = vmatprep.subr.bf16.mxu0 %v251_v16 }
  0x15   :  { %254 = vmatpush3.bf16.msra.mxu0 %v251_v16 }
  0x16   :  { %256 = vmatprep.subr.bf16.mxu0 %v255_v19 }
  0x19   :  { %258 = vmatpush3.bf16.msra.mxu0 %v255_v19 }
  0x1a   :  { %260 = vmatprep.subr.bf16.mxu0 %v259_v22 }
  0x1d   :  { %262 = vmatpush3.bf16.msra.mxu0 %v259_v22 }
  0x1e   :  { %264 = vmatprep.subr.bf16.mxu0 %v263_v25 }
  0x21   :  { %266 = vmatpush3.bf16.msra.mxu0 %v263_v25 }
  0x24   :  { %233 = vmatmul.mubr.f32.vlgmr.msra.gmra.mrb[0].mxu0 %v43_v26 }
  0xf7   :  { %v234_v29 = vpop.f32.mrb[0].mxu0 }
  0xf8   :  { %v120_v30 = vadd.f32 %v234_v29, %v41_v27  ;;  %v110_v31 = vpop.f32.mrb[1].mxu0 }
  0xf9   :  { %v119_v32 = vadd.f32 %v110_v31, %v40_v28 }
  0xfa   :  { %123 = vst.msk [vmem:[#allocation2 + $0x8] sm:$0xff] %vm19_vm0, %v120_v30 }
  0xfb   :  { %122 = vst.msk [vmem:[#allocation2] sm:$0xff] %vm19_vm0, %v119_v32 }
  0xfc   :  { %283 = shalt.err (!%p280_p4)
}
  0xfd   :  { %s284_s24 = scalar_lea.hbm %s433_s2, 256 }
  0xfe   :  { %p285_p5 = scmp.ne.s32.totalorder %s433_s2, %s284_s24  ;;  %p288_p6 = scmp.lt.u32.totalorder %s284_s24, %s433_s2 }
 0x100   :  { %p290_p7 = pnand %p288_p6, %p285_p5 }
 0x102   :  { %293 = shalt.err (!%p290_p7)
}
 0x103   :  { %s322_s29 = smov 128   ;;  %s323_s30 = smov 8   ;;  %v128_v33 = vld [vmem:[#allocation2 + $0x8] sm:$0xff]  ;;  %v127_v34 = vld [vmem:[#allocation2] sm:$0xff]  ;;  %vm138_vm1 = vcmask 122880  }
 0x104   :  { %163 = dma.vmem_to_hbm [thread:$0]  %s158_s22, 256, %s433_s2, [#allocation3], %s322_s29, %s322_s29, %s323_s30   ;;  %v130_v35 = vsel %vm19_vm0, %v128_v33, 0.0  ;;  %v141_v36 = vmul.f32 %v128_v33, %v128_v33  ;;  %v129_v37 = vsel %vm19_vm0, %v127_v34, 0.0  ;;  %v140_v38 = vmul.f32 %v127_v34, %v127_v34 }
 0x105   :  { %v131_v39 = vadd.f32 %v130_v35, %v129_v37  ;;  %s324_s2 = smov [#allocation4]  }
 0x106   :  { %v143_v40 = vsel %vm19_vm0, %v141_v36, 0.0  ;;  %v142_v41 = vsel %vm19_vm0, %v140_v38, 0.0  ;;  %s170_s6 = sshll.u32 %s324_s2, 4  ;;  %s171_s6 = int_to_ptr.vmem [resolvable:$true] %s170_s6 }
 0x107   :  { %v132_v42 = vrot.slane %v131_v39, 4  ;;  %v144_v43 = vadd.f32 %v143_v40, %v142_v41  ;;  %s294_s7 = scalar_lea.vmem %s171_s6, 128  ;;  %p299_p9 = scmp.lt.s32.totalorder %s171_s6, %s171_s6 }
 0x108   :  { %p295_p8 = scmp.ne.s32.totalorder %s171_s6, %s294_s7  ;;  %p300_p10 = scmp.lt.s32.totalorder %s294_s7, %s294_s7 }
 0x109   :  { %v133_v44 = vadd.f32 %v132_v42, %v131_v39  ;;  %v145_v45 = vrot.slane %v144_v43, 4 }
 0x10a   :  { %p301_p11 = por %p300_p10, %p299_p9 }
 0x10b   :  { %v134_v46 = vrot.slane %v133_v44, 2  ;;  %v146_v47 = vadd.f32 %v145_v45, %v144_v43 }
 0x10c   :  { %p302_p12 = pnand %p301_p11, %p295_p8 }
 0x10d   :  { %v135_v48 = vadd.f32 %v134_v46, %v133_v44  ;;  %v147_v49 = vrot.slane %v146_v47, 2 }
 0x10f   :  { %v136_v50 = vrot.slane %v135_v48, 1  ;;  %v148_v51 = vadd.f32 %v147_v49, %v146_v47 }
 0x111   :  { %v137_v52 = vadd.f32 %v136_v50, %v135_v48  ;;  %v149_v53 = vrot.slane %v148_v51, 1 }
 0x113   :  { %139 = vst.msk [vmem:[#allocation4] sm:$0x1] %vm138_vm1, %v137_v52  ;;  %v150_v54 = vadd.f32 %v149_v53, %v148_v51 }
 0x115   :  { %151 = vst.msk [vmem:[#allocation4 + $0x1] sm:$0x1] %vm138_vm1, %v150_v54 }
 0x116   :  { %305 = shalt.err (!%p302_p12)
}
 0x117   :  { %s306_s10 = scalar_lea.hbm %s434_s3, 128 }
 0x118   :  { %p307_p13 = scmp.ne.s32.totalorder %s434_s3, %s306_s10  ;;  %p310_p0 = scmp.lt.u32.totalorder %s306_s10, %s434_s3 }
 0x11a   :  { %p312_p1 = pnand %p310_p0, %p307_p13 }
 0x11c   :  { %315 = shalt.err (!%p312_p1)
}
 0x11d   :  { %173 = dma.vmem_to_hbm [thread:$0]  %s171_s6, 128, %s434_s3, [#allocation5]  }
 0x11e   :  { %316 = dma.done.wait [#allocation3], 256  }
 0x11f   :  { %317 = vsyncadd [#allocation3], 4294967040 }
 0x120   :  { %318 = dma.done.wait [#allocation5], 128  }
 0x121   :  { %319 = vsyncadd [#allocation5], 4294967168 }
 0x122   :  { %180 = vsyncpa [#allocation3], 1 }
 0x123   :  { %181 = vsyncpa [#allocation5], 1 }

</bundles_post_ra>
